<compile_context>
chip_gen: v5e
topology: v5e:2x2
jax: 0.10.0
libtpu: 0.0.40
codegen_flags: <defaults>
</compile_context>

<pallas_src>
from functools import partial

import jax
import jax.numpy as jnp
from jax.experimental import pallas as pl
from jax.experimental.pallas import tpu as pltpu


_EPS = 1e-5          # BatchNorm2d default eps
_SLOPE = 0.01        # LeakyReLU default negative_slope
_VMEM_LIMIT = 32 * 1024 * 1024   # safe on v5e (raises its 16 MiB default) and v6e/v7x


def _round_up(n, m):
    return ((n + m - 1) // m) * m


def _pick_tile_m(m):
    """Largest M tile that still leaves >= 2 grid steps so the pipeline can
    double-buffer; tiny problems fall back to a single resident block."""
    for tm in (1024, 512, 256):
        if m >= 2 * tm:
            return tm
    return _round_up(m, 8)


# ----------------------------------------------------------------------------
# Pallas kernels
# ----------------------------------------------------------------------------

def _conv_stats_kernel(a_ref, w_ref, y_ref, s1_ref, s2_ref):
    """Pass 1: bf16 matmul (f32 accumulate) + per-channel sum / sum-of-squares.

    s1/s2 output BlockSpecs map every grid step to block (0, 0), so they stay
    resident in VMEM across the sequential ('arbitrary') M axis and are written
    back to HBM once after the last step.
    """
    y = jnp.dot(a_ref[...], w_ref[...], preferred_element_type=jnp.float32)
    y_ref[...] = y

    @pl.when(pl.program_id(0) == 0)
    def _():
        s1_ref[...] = jnp.zeros_like(s1_ref)
        s2_ref[...] = jnp.zeros_like(s2_ref)

    s1_ref[...] += jnp.sum(y, axis=0, keepdims=True)
    s2_ref[...] += jnp.sum(y * y, axis=0, keepdims=True)


def _bn_lrelu_kernel(y_ref, s1_ref, s2_ref, g_ref, b_ref, o_ref, *,
                     inv_m, eps, slope):
    """Pass 2: BatchNorm (global batch stats, biased var = E[y^2]-E[y]^2,
    training-mode forward) + affine + LeakyReLU."""
    mean = s1_ref[...] * inv_m                     # (1, Cout)
    var = s2_ref[...] * inv_m - mean * mean        # biased variance
    scale = g_ref[...] * jax.lax.rsqrt(var + eps)
    shift = b_ref[...] - mean * scale
    z = y_ref[...] * scale + shift
    o_ref[...] = jnp.where(z >= 0, z, slope * z)


# ----------------------------------------------------------------------------
# Wrapper
# ----------------------------------------------------------------------------

def _im2col(x_nhwc, ksize, pad):
    """(B,H,W,C) -> (B*H*W, K*K*C), stride 1, columns ordered (ky, kx, cin)."""
    # TODO(synk): a direct-conv Pallas kernel with halo'd input tiles would
    # avoid the K*K im2col HBM amplification; kept as XLA data movement here.
    b, h, w, c = x_nhwc.shape
    xp = jnp.pad(x_nhwc, ((0, 0), (pad, pad), (pad, pad), (0, 0)))
    cols = [xp[:, ky:ky + h, kx:kx + w, :]
            for ky in range(ksize) for kx in range(ksize)]
    patches = jnp.concatenate(cols, axis=-1)
    return patches.reshape(b * h * w, ksize * ksize * c)


def basic_conv2d(x_nchw, wmat_bf16, gamma, beta, *, ksize, pad):
    """BasicConv2d forward (NCHW in / NCHW out)."""
    b, cin, h, w = x_nchw.shape
    kk_cin, cout = wmat_bf16.shape
    assert kk_cin == ksize * ksize * cin

    x_nhwc = jnp.transpose(x_nchw, (0, 2, 3, 1)).astype(jnp.bfloat16)
    patches = _im2col(x_nhwc, ksize, pad)            # (M, K*K*Cin) bf16
    m_real, kdim = patches.shape

    tm = _pick_tile_m(m_real)
    m_pad = _round_up(m_real, tm)
    if m_pad != m_real:
        # Zero rows give zero conv rows -> contribute 0 to sum and sumsq, and
        # we divide by the real row count, so BN statistics stay exact.
        patches = jnp.pad(patches, ((0, m_pad - m_real), (0, 0)))
    grid_m = m_pad // tm

    # --- pass 1: conv (bf16 MXU, f32 accumulate) + channel sums -------------
    y, s1, s2 = pl.pallas_call(
        _conv_stats_kernel,
        out_shape=(jax.ShapeDtypeStruct((m_pad, cout), jnp.float32),
                   jax.ShapeDtypeStruct((1, cout), jnp.float32),
                   jax.ShapeDtypeStruct((1, cout), jnp.float32)),
        grid=(grid_m,),
        in_specs=[pl.BlockSpec((tm, kdim), lambda i: (i, 0)),
                  pl.BlockSpec((kdim, cout), lambda i: (0, 0))],
        out_specs=(pl.BlockSpec((tm, cout), lambda i: (i, 0)),
                   pl.BlockSpec((1, cout), lambda i: (0, 0)),
                   pl.BlockSpec((1, cout), lambda i: (0, 0))),
        compiler_params=pltpu.CompilerParams(
            dimension_semantics=("arbitrary",),
            vmem_limit_bytes=_VMEM_LIMIT),
    )(patches, wmat_bf16)

    # --- pass 2: BN (global stats) + LeakyReLU, parallel over M -------------
    out = pl.pallas_call(
        partial(_bn_lrelu_kernel, inv_m=1.0 / m_real, eps=_EPS, slope=_SLOPE),
        out_shape=jax.ShapeDtypeStruct((m_pad, cout), jnp.float32),
        grid=(grid_m,),
        in_specs=[pl.BlockSpec((tm, cout), lambda i: (i, 0)),
                  pl.BlockSpec((1, cout), lambda i: (0, 0)),
                  pl.BlockSpec((1, cout), lambda i: (0, 0)),
                  pl.BlockSpec((1, cout), lambda i: (0, 0)),
                  pl.BlockSpec((1, cout), lambda i: (0, 0))],
        out_specs=pl.BlockSpec((tm, cout), lambda i: (i, 0)),
        compiler_params=pltpu.CompilerParams(
            dimension_semantics=("parallel",),
            vmem_limit_bytes=_VMEM_LIMIT),
    )(y, s1, s2, gamma, beta)

    out = out[:m_real].reshape(b, h, w, cout)
    return jnp.transpose(out, (0, 3, 1, 2))          # NHWC -> NCHW


# ----------------------------------------------------------------------------
# Params (deterministic) + pure-JAX reference for a sanity check
# ----------------------------------------------------------------------------

def init_params(key, in_channels, out_channels, ksize):
    w = jax.random.normal(
        key, (out_channels, in_channels, ksize, ksize), jnp.float32) * 0.1
    # Hoisted to init time: PyTorch (Cout,Cin,K,K) -> (K*K*Cin, Cout) matching
    # the (ky, kx, cin) im2col column ordering; cast once to bf16 for the MXU.
    wmat = jnp.transpose(w, (2, 3, 1, 0)).reshape(
        ksize * ksize * in_channels, out_channels)
    return {
        "w_f32": w,                                        # for the reference check
        "wmat": wmat.astype(jnp.bfloat16),
        "gamma": jnp.ones((1, out_channels), jnp.float32),  # BN default weight
        "beta": jnp.zeros((1, out_channels), jnp.float32),  # BN default bias
    }


def reference_forward(x_nchw, w, gamma, beta, *, pad):
    y = jax.lax.conv_general_dilated(
        x_nchw, w, window_strides=(1, 1),
        padding=((pad, pad), (pad, pad)),
        dimension_numbers=("NCHW", "OIHW", "NCHW"))
    mean = jnp.mean(y, axis=(0, 2, 3), keepdims=True)
    var = jnp.mean((y - mean) ** 2, axis=(0, 2, 3), keepdims=True)
    z = (y - mean) * jax.lax.rsqrt(var + _EPS)
    z = z * gamma.reshape(1, -1, 1, 1) + beta.reshape(1, -1, 1, 1)
    return jnp.where(z >= 0, z, _SLOPE * z)


# ----------------------------------------------------------------------------
# Main
# ----------------------------------------------------------------------------

if __name__ == "__main__":
    key = jax.random.PRNGKey(0)
    k_x, k_w = jax.random.split(key)

    B, CIN, H, W = 2, 4, 16, 16
    COUT, KSIZE, PAD = 32, 3, 1

    x = jax.random.normal(k_x, (B, CIN, H, W), jnp.float32)
    params = init_params(k_w, CIN, COUT, KSIZE)

    fwd = jax.jit(partial(basic_conv2d, ksize=KSIZE, pad=PAD))
    out = fwd(x, params["wmat"], params["gamma"], params["beta"])
    out = jax.block_until_ready(out)

    assert out.shape == (B, COUT, H, W), out.shape
    assert bool(jnp.all(jnp.isfinite(out)))

    # Loose tolerance: bf16 MXU operands (f32 accumulation) vs f32 reference.
    ref = reference_forward(x, params["w_f32"], params["gamma"], params["beta"],
                            pad=PAD)
    max_err = float(jnp.max(jnp.abs(out - ref)))
    assert max_err < 0.1, max_err

    print("KERNEL_OK")
</pallas_src>

<mosaic_0001>
module attributes {stable_mosaic.version = 11 : i64} {
  func.func @_conv_stats_kernel(%arg0: i32, %arg1: memref<256x36xbf16, #tpu.memory_space<vmem>>, %arg2: memref<36x32xbf16, #tpu.memory_space<vmem>>, %arg3: memref<256x32xf32, #tpu.memory_space<vmem>>, %arg4: memref<1x32xf32, #tpu.memory_space<vmem>>, %arg5: memref<1x32xf32, #tpu.memory_space<vmem>>) attributes {dimension_semantics = [#tpu.dimension_semantics<arbitrary>], iteration_bounds = array<i64: 2>, scalar_prefetch = 0 : i64, scratch_operands = 0 : i64, tpu.core_type = #tpu.core_type<tc>, window_params = [{transform_indices = @transform_0, window_bounds = array<i64: 256, 36>}, {pipeline_mode = #tpu.pipeline_mode<synchronous>, transform_indices = @transform_1, window_bounds = array<i64: 36, 32>}, {transform_indices = @transform_2, window_bounds = array<i64: 256, 32>}, {pipeline_mode = #tpu.pipeline_mode<synchronous>, transform_indices = @transform_3, window_bounds = array<i64: 1, 32>}, {pipeline_mode = #tpu.pipeline_mode<synchronous>, transform_indices = @transform_4, window_bounds = array<i64: 1, 32>}]} {
    %c0 = arith.constant 0 : index
    %c0_0 = arith.constant 0 : index
    %0 = vector.load %arg1[%c0, %c0_0] : memref<256x36xbf16, #tpu.memory_space<vmem>>, vector<256x36xbf16>
    %c0_1 = arith.constant 0 : index
    %c0_2 = arith.constant 0 : index
    %1 = vector.load %arg2[%c0_1, %c0_2] : memref<36x32xbf16, #tpu.memory_space<vmem>>, vector<36x32xbf16>
    %cst = arith.constant dense<0.000000e+00> : vector<256x32xf32>
    %2 = tpu.matmul %0, %1, %cst {dimension_numbers = #tpu.dot_dimension_numbers<[1], [0], [0], [1], [0, 0, 1, 1], [], []>} : vector<256x36xbf16>, vector<36x32xbf16>, vector<256x32xf32> -> vector<256x32xf32>
    %c0_3 = arith.constant 0 : index
    %c0_4 = arith.constant 0 : index
    %3 = vector.load %arg3[%c0_3, %c0_4] : memref<256x32xf32, #tpu.memory_space<vmem>>, vector<256x32xf32>
    tpu.vector_store %arg3[%c0_3, %c0_4], %2 {strides = array<i32>} : memref<256x32xf32, #tpu.memory_space<vmem>>, vector<256x32xf32>,
    %c0_i32 = arith.constant 0 : i32
    %4 = arith.cmpi eq, %arg0, %c0_i32 : i32
    %5 = arith.extui %4 : i1 to i32
    %c0_i32_5 = arith.constant 0 : i32
    %6 = arith.cmpi ne, %5, %c0_i32_5 : i32
    scf.if %6 {
      %cst_16 = arith.constant 0.000000e+00 : f32
      %18 = vector.broadcast %cst_16 : f32 to vector<1x32xf32>
      %c0_17 = arith.constant 0 : index
      %c0_18 = arith.constant 0 : index
      %19 = vector.load %arg4[%c0_17, %c0_18] : memref<1x32xf32, #tpu.memory_space<vmem>>, vector<1x32xf32>
      tpu.vector_store %arg4[%c0_17, %c0_18], %18 {strides = array<i32>} : memref<1x32xf32, #tpu.memory_space<vmem>>, vector<1x32xf32>,
      %cst_19 = arith.constant 0.000000e+00 : f32
      %20 = vector.broadcast %cst_19 : f32 to vector<1x32xf32>
      %c0_20 = arith.constant 0 : index
      %c0_21 = arith.constant 0 : index
      %21 = vector.load %arg5[%c0_20, %c0_21] : memref<1x32xf32, #tpu.memory_space<vmem>>, vector<1x32xf32>
      tpu.vector_store %arg5[%c0_20, %c0_21], %20 {strides = array<i32>} : memref<1x32xf32, #tpu.memory_space<vmem>>, vector<1x32xf32>,
    } else {
    }
    %c0_6 = arith.constant 0 : index
    %c0_7 = arith.constant 0 : index
    %7 = vector.load %arg4[%c0_6, %c0_7] : memref<1x32xf32, #tpu.memory_space<vmem>>, vector<1x32xf32>
    %cst_8 = arith.constant dense<0.000000e+00> : vector<32xf32>
    %8 = vector.multi_reduction <add>, %2, %cst_8 [0] : vector<256x32xf32> to vector<32xf32>
    %9 = vector.shape_cast %8 : vector<32xf32> to vector<1x32xf32>
    %10 = arith.addf %7, %9 : vector<1x32xf32>
    %c0_9 = arith.constant 0 : index
    %c0_10 = arith.constant 0 : index
    %11 = vector.load %arg4[%c0_9, %c0_10] : memref<1x32xf32, #tpu.memory_space<vmem>>, vector<1x32xf32>
    tpu.vector_store %arg4[%c0_9, %c0_10], %10 {strides = array<i32>} : memref<1x32xf32, #tpu.memory_space<vmem>>, vector<1x32xf32>,
    %c0_11 = arith.constant 0 : index
    %c0_12 = arith.constant 0 : index
    %12 = vector.load %arg5[%c0_11, %c0_12] : memref<1x32xf32, #tpu.memory_space<vmem>>, vector<1x32xf32>
    %13 = arith.mulf %2, %2 : vector<256x32xf32>
    %cst_13 = arith.constant dense<0.000000e+00> : vector<32xf32>
    %14 = vector.multi_reduction <add>, %13, %cst_13 [0] : vector<256x32xf32> to vector<32xf32>
    %15 = vector.shape_cast %14 : vector<32xf32> to vector<1x32xf32>
    %16 = arith.addf %12, %15 : vector<1x32xf32>
    %c0_14 = arith.constant 0 : index
    %c0_15 = arith.constant 0 : index
    %17 = vector.load %arg5[%c0_14, %c0_15] : memref<1x32xf32, #tpu.memory_space<vmem>>, vector<1x32xf32>
    tpu.vector_store %arg5[%c0_14, %c0_15], %16 {strides = array<i32>} : memref<1x32xf32, #tpu.memory_space<vmem>>, vector<1x32xf32>,
    return
  }
  func.func @transform_0(%arg0: i32) -> (i32, i32) {
    %c0_i32 = arith.constant 0 : i32
    %c0_i32_0 = arith.constant 0 : i32
    return %arg0, %c0_i32 : i32, i32
  }
  func.func @transform_1(%arg0: i32) -> (i32, i32) {
    %c0_i32 = arith.constant 0 : i32
    %c0_i32_0 = arith.constant 0 : i32
    %c0_i32_1 = arith.constant 0 : i32
    return %c0_i32, %c0_i32_0 : i32, i32
  }
  func.func @transform_2(%arg0: i32) -> (i32, i32) {
    %c0_i32 = arith.constant 0 : i32
    %c0_i32_0 = arith.constant 0 : i32
    return %arg0, %c0_i32 : i32, i32
  }
  func.func @transform_3(%arg0: i32) -> (i32, i32) {
    %c0_i32 = arith.constant 0 : i32
    %c0_i32_0 = arith.constant 0 : i32
    %c0_i32_1 = arith.constant 0 : i32
    return %c0_i32, %c0_i32_0 : i32, i32
  }
  func.func @transform_4(%arg0: i32) -> (i32, i32) {
    %c0_i32 = arith.constant 0 : i32
    %c0_i32_0 = arith.constant 0 : i32
    %c0_i32_1 = arith.constant 0 : i32
    return %c0_i32, %c0_i32_0 : i32, i32
  }
}

module attributes {stable_mosaic.version = 11 : i64} {
  func.func @_bn_lrelu_kernel(%arg0: i32, %arg1: memref<256x32xf32, #tpu.memory_space<vmem>>, %arg2: memref<1x32xf32, #tpu.memory_space<vmem>>, %arg3: memref<1x32xf32, #tpu.memory_space<vmem>>, %arg4: memref<1x32xf32, #tpu.memory_space<vmem>>, %arg5: memref<1x32xf32, #tpu.memory_space<vmem>>, %arg6: memref<256x32xf32, #tpu.memory_space<vmem>>) attributes {dimension_semantics = [#tpu.dimension_semantics<parallel>], iteration_bounds = array<i64: 2>, scalar_prefetch = 0 : i64, scratch_operands = 0 : i64, tpu.core_type = #tpu.core_type<tc>, window_params = [{transform_indices = @transform_0, window_bounds = array<i64: 256, 32>}, {pipeline_mode = #tpu.pipeline_mode<synchronous>, transform_indices = @transform_1, window_bounds = array<i64: 1, 32>}, {pipeline_mode = #tpu.pipeline_mode<synchronous>, transform_indices = @transform_2, window_bounds = array<i64: 1, 32>}, {pipeline_mode = #tpu.pipeline_mode<synchronous>, transform_indices = @transform_3, window_bounds = array<i64: 1, 32>}, {pipeline_mode = #tpu.pipeline_mode<synchronous>, transform_indices = @transform_4, window_bounds = array<i64: 1, 32>}, {transform_indices = @transform_5, window_bounds = array<i64: 256, 32>}]} {
    %c0 = arith.constant 0 : index
    %c0_0 = arith.constant 0 : index
    %0 = vector.load %arg2[%c0, %c0_0] : memref<1x32xf32, #tpu.memory_space<vmem>>, vector<1x32xf32>
    %cst = arith.constant 0.001953125 : f32
    %1 = vector.broadcast %cst : f32 to vector<1x32xf32>
    %2 = arith.mulf %0, %1 : vector<1x32xf32>
    %c0_1 = arith.constant 0 : index
    %c0_2 = arith.constant 0 : index
    %3 = vector.load %arg3[%c0_1, %c0_2] : memref<1x32xf32, #tpu.memory_space<vmem>>, vector<1x32xf32>
    %cst_3 = arith.constant 0.001953125 : f32
    %4 = vector.broadcast %cst_3 : f32 to vector<1x32xf32>
    %5 = arith.mulf %3, %4 : vector<1x32xf32>
    %6 = arith.mulf %2, %2 : vector<1x32xf32>
    %7 = arith.subf %5, %6 : vector<1x32xf32>
    %c0_4 = arith.constant 0 : index
    %c0_5 = arith.constant 0 : index
    %8 = vector.load %arg4[%c0_4, %c0_5] : memref<1x32xf32, #tpu.memory_space<vmem>>, vector<1x32xf32>
    %cst_6 = arith.constant 9.99999974E-6 : f32
    %9 = vector.broadcast %cst_6 : f32 to vector<1x32xf32>
    %10 = arith.addf %7, %9 : vector<1x32xf32>
    %11 = math.rsqrt %10 : vector<1x32xf32>
    %12 = arith.mulf %8, %11 : vector<1x32xf32>
    %c0_7 = arith.constant 0 : index
    %c0_8 = arith.constant 0 : index
    %13 = vector.load %arg5[%c0_7, %c0_8] : memref<1x32xf32, #tpu.memory_space<vmem>>, vector<1x32xf32>
    %14 = arith.mulf %2, %12 : vector<1x32xf32>
    %15 = arith.subf %13, %14 : vector<1x32xf32>
    %c0_9 = arith.constant 0 : index
    %c0_10 = arith.constant 0 : index
    %16 = vector.load %arg1[%c0_9, %c0_10] : memref<256x32xf32, #tpu.memory_space<vmem>>, vector<256x32xf32>
    %17 = vector.broadcast %12 : vector<1x32xf32> to vector<256x32xf32>
    %18 = arith.mulf %16, %17 : vector<256x32xf32>
    %19 = vector.broadcast %15 : vector<1x32xf32> to vector<256x32xf32>
    %20 = arith.addf %18, %19 : vector<256x32xf32>
    %cst_11 = arith.constant 0.000000e+00 : f32
    %21 = vector.broadcast %cst_11 : f32 to vector<256x32xf32>
    %22 = arith.cmpf oge, %20, %21 : vector<256x32xf32>
    %cst_12 = arith.constant 0.00999999977 : f32
    %23 = vector.broadcast %cst_12 : f32 to vector<256x32xf32>
    %24 = arith.mulf %23, %20 : vector<256x32xf32>
    %25 = arith.select %22, %20, %24 : vector<256x32xi1>, vector<256x32xf32>
    %c0_13 = arith.constant 0 : index
    %c0_14 = arith.constant 0 : index
    %26 = vector.load %arg6[%c0_13, %c0_14] : memref<256x32xf32, #tpu.memory_space<vmem>>, vector<256x32xf32>
    tpu.vector_store %arg6[%c0_13, %c0_14], %25 {strides = array<i32>} : memref<256x32xf32, #tpu.memory_space<vmem>>, vector<256x32xf32>,
    return
  }
  func.func @transform_0(%arg0: i32) -> (i32, i32) {
    %c0_i32 = arith.constant 0 : i32
    %c0_i32_0 = arith.constant 0 : i32
    return %arg0, %c0_i32 : i32, i32
  }
  func.func @transform_1(%arg0: i32) -> (i32, i32) {
    %c0_i32 = arith.constant 0 : i32
    %c0_i32_0 = arith.constant 0 : i32
    %c0_i32_1 = arith.constant 0 : i32
    return %c0_i32, %c0_i32_0 : i32, i32
  }
  func.func @transform_2(%arg0: i32) -> (i32, i32) {
    %c0_i32 = arith.constant 0 : i32
    %c0_i32_0 = arith.constant 0 : i32
    %c0_i32_1 = arith.constant 0 : i32
    return %c0_i32, %c0_i32_0 : i32, i32
  }
  func.func @transform_3(%arg0: i32) -> (i32, i32) {
    %c0_i32 = arith.constant 0 : i32
    %c0_i32_0 = arith.constant 0 : i32
    %c0_i32_1 = arith.constant 0 : i32
    return %c0_i32, %c0_i32_0 : i32, i32
  }
  func.func @transform_4(%arg0: i32) -> (i32, i32) {
    %c0_i32 = arith.constant 0 : i32
    %c0_i32_0 = arith.constant 0 : i32
    %c0_i32_1 = arith.constant 0 : i32
    return %c0_i32, %c0_i32_0 : i32, i32
  }
  func.func @transform_5(%arg0: i32) -> (i32, i32) {
    %c0_i32 = arith.constant 0 : i32
    %c0_i32_0 = arith.constant 0 : i32
    return %arg0, %c0_i32 : i32, i32
  }
}

</mosaic_0001>

<bundles_post_ra>
// kernel: basic_conv2d.3
= control target key start
LH: loop header
LB: loop body
LE: loop exit
PB: predicated region body
PF: predicated region fallthrough
CT: control target
= control target key end

     0   :  { %10 = vsyncpa [#allocation3], 0  ;;  %s983_s0 = inlined_call_operand.vmem [shape: f32[512,32], index: 0, kind: input, shape index: {}]   ;;  %s984_s1 = inlined_call_operand.vmem [shape: f32[1,32], index: 1, kind: input, shape index: {}]   ;;  %s985_s2 = inlined_call_operand.vmem [shape: f32[1,32], index: 2, kind: input, shape index: {}]   ;;  %s986_s3 = inlined_call_operand.vmem [shape: f32[1,32], index: 3, kind: input, shape index: {}]   ;;  %s987_s4 = inlined_call_operand.vmem [shape: f32[1,32], index: 4, kind: input, shape index: {}]   ;;  %s988_s5 = inlined_call_operand.hbm [shape: f32[512,32], index: 5, kind: output, shape index: {}]  }
   0x1   :  { %12 = vsyncpa [#allocation3 + $0x1], 0  ;;  %s709_s18 = smov 0   ;;  %s711_s19 = smov 0  }
   0x2   :  { %s713_s20 = smov 0   ;;  %s715_s21 = smov 0  }
   0x3 LB: > { %s730_s22 = sadd.s32 4294967295, %s675_s21   ;;  %s557_s23 = sadd.s32 4294967294, %s675_s21   ;;  %s675_s21 = sphi %s715_s21, %s994_s21   ;;  %s671_s20 = sphi %s713_s20, %s993_s20   ;;  %s667_s19 = sphi %s711_s19, %s992_s19   ;;  %s663_s18 = sphi %s709_s18, %s991_s18  }
   0x4   : > { %s734_s24 = sadd.s32 1, %s675_s21   ;;  %s135_s25 = sadd.s32 1, %s671_s20 }
   0x5   : > { %s132_s26 = ssub.s32 %s675_s21, %s734_s24  ;;  %p145_p0 = scmp.ne.s32.totalorder %s671_s20, %s667_s19 }
   0x6   : > { %p133_p1 = scmp.eq.s32.totalorder %s132_s26, 0  ;;  %p146_p2 = scmp.eq.s32.totalorder %s730_s22, 1 }
   0x7   : > { %p151_p3 = scmp.ne.s32.totalorder %s667_s19, %s663_s18  ;;  %p152_p4 = scmp.eq.s32.totalorder %s557_s23, 1 }
   0x8   : > { %s745_s27 = scalar_select %p133_p1, %s671_s20, %s135_s25  }
   0x9   : > { %p747_p5 = por %p146_p2, %p145_p0  ;;  %p751_p6 = por %p152_p4, %p151_p3 }
   0xa   : > { %p560_p7 = scmp.ge.s32.totalorder %s675_s21, 1  ;;  %p191_p8 = scmp.lt.s32.totalorder %s675_s21, 3 }
   0xc   : > { %p192_p9 = pnand %p560_p7, %p191_p8 }
   0xd   : > { %s562_s9 = sshll.u32 (!%p192_p9), %s730_s22, 5  ;;  %s216_s23 = sand.u32 (!%p192_p9), 1, %s667_s19  }
   0xe   : > { %195 = sbr.rel (%p192_p9) target bundleno = 98 (0x62), region = 40  ;;  %p220_p10 = scmp.lt.s32.totalorder (!%p192_p9), %s562_s9, 63 }
   0xf   : > { %s561_s25 = sshll.u32 (!%p192_p9), %s216_s23, 8  ;;  %s569_s30 = sshll.u32 (!%p192_p9), %s730_s22, 8 }
  0x10   : > { %s818_s26 = scalar_lea.vmem (!%p192_p9), [#allocation2], %s561_s25  ;;  %s491_s7 = scalar_lea.hbm (!%p192_p9), %s988_s5, %s569_s30 }
  0x11   : > { %s492_s8 = sshll.u32 (!%p192_p9), %s818_s26, 4  ;;  %s633_s15 = scalar_lea.hbm (!%p192_p9), %s988_s5, 512  ;;  %s493_s8 = int_to_ptr.vmem [resolvable:$true] %s492_s8 }
  0x13   : > { %v226_v0 = vld [vmem:[%s984_s1] sm:$0x1]  ;;  %s996_s9 = smov (!%p220_p10, %s562_s9), 63  ;;  %vm446_vm3 = vcmask 261120  }
  0x14   : > { %v228_v1 = vld [vmem:[%s985_s2] sm:$0x1]  ;;  %v227_v2 = vmul.f32 0.001953125, %v226_v0  ;;  %s563_s10 = sshll.u32 %s996_s9, 3  ;;  %s494_s9 = sshll.u32 %s491_s7, 4  ;;  %s495_s9 = int_to_ptr.hbm [resolvable:$true] %s494_s9 }
  0x15   : > { %v229_v3 = vmul.f32 0.001953125, %v228_v1  ;;  %s767_s13 = scalar_lea.vmem %s983_s0, %s563_s10  ;;  %v232_v12 = vld [vmem:[%s986_s3] sm:$0x1]  ;;  %s480_s10 = scalar_lea.sflag [#allocation3], %s216_s23 }
  0x16   : > { %v230_v4 = vmul.f32 %v227_v2, %v227_v2  ;;  %v245_v16 = vld [vmem:[%s987_s4] sm:$0x1]  ;;  %v249_v18 = vld [vmem:[%s767_s13 + $0x8] sm:$0xff]  ;;  %v250_v19 = vld [vmem:[%s767_s13 + $0x10] sm:$0xff]  ;;  %s627_s11 = sshra.s32 %s495_s9, 4  ;;  %s628_s11 = int_to_ptr.hbm [resolvable:$true] %s627_s11 }
  0x17   : > { %v248_v17 = vld [vmem:[%s767_s13] sm:$0xff]  ;;  %v251_v20 = vld [vmem:[%s767_s13 + $0x18] sm:$0xff]  ;;  %v253_v24 = vld [vmem:[%s767_s13 + $0x28] sm:$0xff]  ;;  %s629_s12 = scalar_lea.hbm %s628_s11, 256  ;;  %p634_p0 = scmp.lt.s32.totalorder %s628_s11, %s988_s5 }
  0x18   : > { %v231_v5 = vsub.f32 %v229_v3, %v230_v4  ;;  %v252_v21 = vld [vmem:[%s767_s13 + $0x20] sm:$0xff]  ;;  %v254_v25 = vld [vmem:[%s767_s13 + $0x30] sm:$0xff]  ;;  %v255_v26 = vld [vmem:[%s767_s13 + $0x38] sm:$0xff]  ;;  %p630_p11 = scmp.ne.s32.totalorder %s628_s11, %s629_s12  ;;  %p635_p1 = scmp.lt.s32.totalorder %s633_s15, %s629_s12 }
  0x19   : > { %v256_v27 = vld [vmem:[%s767_s13 + $0x40] sm:$0xff]  ;;  %v257_v28 = vld [vmem:[%s767_s13 + $0x48] sm:$0xff]  ;;  %v258_v29 = vld [vmem:[%s767_s13 + $0x50] sm:$0xff] }
  0x1a   : > { %v233_v6 = vadd.f32 1e-05, %v231_v5  ;;  %v259_v34 = vld [vmem:[%s767_s13 + $0x58] sm:$0xff]  ;;  %v260_v35 = vld [vmem:[%s767_s13 + $0x60] sm:$0xff]  ;;  %v261_v36 = vld [vmem:[%s767_s13 + $0x68] sm:$0xff]  ;;  %p631_p12 = pnand %p630_p11, %p747_p5  ;;  %p636_p2 = por %p635_p1, %p634_p0 }
  0x1c   : > { %611 = vrsqrt.f32 %v233_v6  ;;  %vm240_vm0 = vweird.f32 %v233_v6  ;;  %p632_p13 = pneg %p631_p12 }
  0x1e   : > { %p637_p3 = pnand %p636_p2, %p632_p13 }
  0x22   : > { %v612_v7 = vpop.eup %611 }
  0x23   : > { %v235_v8 = vmul.f32 %v612_v7, %v233_v6  ;;  %vm241_vm1 = vweird.f32 %v612_v7 }
  0x24   : > { %vm242_vm2 = vmor %vm240_vm0, %vm241_vm1 }
  0x25   : > { %v236_v9 = vmul.f32 %v612_v7, %v235_v8 }
  0x27   : > { %v237_v10 = vmul.f32 0.5, %v236_v9 }
  0x29   : > { %v238_v11 = vsub.f32 1.5, %v237_v10 }
  0x2b   : > { %v239_v13 = vmul.f32 %v612_v7, %v238_v11 }
  0x2d   : > { %v243_v14 = vsel %vm242_vm2, %v612_v7, %v239_v13  ;;  %v262_v13 = vld [vmem:[%s767_s13 + $0x70] sm:$0xff] }
  0x2e   : > { %v244_v15 = vmul.f32 %v243_v14, %v232_v12  ;;  %v263_v14 = vld [vmem:[%s767_s13 + $0x78] sm:$0xff] }
  0x30   : > { %v246_v22 = vmul.f32 %v244_v15, %v227_v2  ;;  %v780_v23 = vperm.slane %v244_v15, 0 }
  0x32   : > { %v247_v30 = vsub.f32 %v245_v16, %v246_v22  ;;  %v283_v31 = vmul.f32 %v780_v23, %v248_v17  ;;  %v284_v32 = vmul.f32 %v780_v23, %v249_v18  ;;  %v285_v33 = vmul.f32 %v780_v23, %v250_v19  ;;  %v264_v17 = vld [vmem:[%s767_s13 + $0x80] sm:$0xff]  ;;  %v265_v18 = vld [vmem:[%s767_s13 + $0x88] sm:$0xff] }
  0x33   : > { %v286_v37 = vmul.f32 %v780_v23, %v251_v20  ;;  %v287_v38 = vmul.f32 %v780_v23, %v252_v21  ;;  %v288_v39 = vmul.f32 %v780_v23, %v253_v24  ;;  %v289_v40 = vmul.f32 %v780_v23, %v254_v25  ;;  %v266_v25 = vld [vmem:[%s767_s13 + $0x90] sm:$0xff] }
  0x34   : > { %v801_v41 = vperm.slane %v247_v30, 0  ;;  %v290_v42 = vmul.f32 %v780_v23, %v255_v26  ;;  %v291_v43 = vmul.f32 %v780_v23, %v256_v27  ;;  %v292_v44 = vmul.f32 %v780_v23, %v257_v28 }
  0x35   : > { %v293_v45 = vmul.f32 %v780_v23, %v258_v29  ;;  %v294_v46 = vmul.f32 %v780_v23, %v259_v34  ;;  %v295_v47 = vmul.f32 %v780_v23, %v260_v35  ;;  %v296_v48 = vmul.f32 %v780_v23, %v261_v36  ;;  %v267_v29 = vld [vmem:[%s767_s13 + $0x98] sm:$0xff]  ;;  %v268_v34 = vld [vmem:[%s767_s13 + $0xa0] sm:$0xff] }
  0x36   : > { %v318_v49 = vadd.f32 %v801_v41, %v283_v31  ;;  %v319_v50 = vadd.f32 %v801_v41, %v284_v32  ;;  %v320_v51 = vadd.f32 %v801_v41, %v285_v33  ;;  %v321_v52 = vadd.f32 %v801_v41, %v286_v37 }
  0x37   : > { %v322_v53 = vadd.f32 %v801_v41, %v287_v38  ;;  %v323_v54 = vadd.f32 %v801_v41, %v288_v39  ;;  %v324_v55 = vadd.f32 %v801_v41, %v289_v40  ;;  %v325_v56 = vadd.f32 %v801_v41, %v290_v42 }
  0x38   : > { %vm350_vm4 = vcmp.ge.f32.partialorder %v318_v49, 0.0  ;;  %v382_v57 = vmul.f32 0.01, %v318_v49  ;;  %vm351_vm5 = vcmp.ge.f32.partialorder %v319_v50, 0.0  ;;  %v383_v58 = vmul.f32 0.01, %v319_v50 }
  0x39   : > { %vm352_vm6 = vcmp.ge.f32.partialorder %v320_v51, 0.0  ;;  %v384_v59 = vmul.f32 0.01, %v320_v51  ;;  %vm353_vm7 = vcmp.ge.f32.partialorder %v321_v52, 0.0  ;;  %v385_v60 = vmul.f32 0.01, %v321_v52 }
  0x3a   : > { %v414_v61 = vsel %vm350_vm4, %v318_v49, %v382_v57  ;;  %v415_v62 = vsel %vm351_vm5, %v319_v50, %v383_v58  ;;  %vm354_vm8 = vcmp.ge.f32.partialorder %v322_v53, 0.0  ;;  %v386_v63 = vmul.f32 0.01, %v322_v53  ;;  %v269_v50 = vld [vmem:[%s767_s13 + $0xa8] sm:$0xff]  ;;  %v271_v57 = vld [vmem:[%s767_s13 + $0xb8] sm:$0xff]  ;;  %v272_v58 = vld [vmem:[%s767_s13 + $0xc0] sm:$0xff] }
  0x3b   : > { %447 = vst.msk [vmem:[%s818_s26] sm:$0xff] %vm446_vm3, %v414_v61  ;;  %v416_v0 = vsel %vm352_vm6, %v320_v51, %v384_v59  ;;  %v417_v1 = vsel %vm353_vm7, %v321_v52, %v385_v60  ;;  %vm355_vm9 = vcmp.ge.f32.partialorder %v323_v54, 0.0  ;;  %v387_v2 = vmul.f32 0.01, %v323_v54  ;;  %v270_v51 = vld [vmem:[%s767_s13 + $0xb0] sm:$0xff] }
  0x3c   : > { %448 = vst.msk [vmem:[%s818_s26 + $0x8] sm:$0xff] %vm446_vm3, %v415_v62  ;;  %v418_v3 = vsel %vm354_vm8, %v322_v53, %v386_v63  ;;  %vm356_vm10 = vcmp.ge.f32.partialorder %v324_v55, 0.0  ;;  %v388_v4 = vmul.f32 0.01, %v324_v55  ;;  %vm357_vm11 = vcmp.ge.f32.partialorder %v325_v56, 0.0  ;;  %v273_v62 = vld [vmem:[%s767_s13 + $0xc8] sm:$0xff] }
  0x3d   : > { %449 = vst.msk [vmem:[%s818_s26 + $0x10] sm:$0xff] %vm446_vm3, %v416_v0  ;;  %v419_v5 = vsel %vm355_vm9, %v323_v54, %v387_v2  ;;  %v389_v6 = vmul.f32 0.01, %v325_v56  ;;  %v326_v7 = vadd.f32 %v801_v41, %v291_v43  ;;  %v327_v8 = vadd.f32 %v801_v41, %v292_v44  ;;  %v274_v63 = vld [vmem:[%s767_s13 + $0xd0] sm:$0xff] }
  0x3e   : > { %450 = vst.msk [vmem:[%s818_s26 + $0x18] sm:$0xff] %vm446_vm3, %v417_v1  ;;  %v420_v9 = vsel %vm356_vm10, %v324_v55, %v388_v4  ;;  %v328_v10 = vadd.f32 %v801_v41, %v293_v45  ;;  %v329_v11 = vadd.f32 %v801_v41, %v294_v46  ;;  %v330_v12 = vadd.f32 %v801_v41, %v295_v47 }
  0x3f   : > { %451 = vst.msk [vmem:[%s818_s26 + $0x20] sm:$0xff] %vm446_vm3, %v418_v3  ;;  %v421_v15 = vsel %vm357_vm11, %v325_v56, %v389_v6  ;;  %vm358_vm12 = vcmp.ge.f32.partialorder %v326_v7, 0.0  ;;  %v390_v16 = vmul.f32 0.01, %v326_v7  ;;  %vm359_vm13 = vcmp.ge.f32.partialorder %v327_v8, 0.0 }
  0x40   : > { %452 = vst.msk [vmem:[%s818_s26 + $0x28] sm:$0xff] %vm446_vm3, %v419_v5  ;;  %v391_v19 = vmul.f32 0.01, %v327_v8  ;;  %vm360_vm14 = vcmp.ge.f32.partialorder %v328_v10, 0.0  ;;  %v392_v20 = vmul.f32 0.01, %v328_v10  ;;  %v331_v21 = vadd.f32 %v801_v41, %v296_v48 }
  0x41   : > { %453 = vst.msk [vmem:[%s818_s26 + $0x30] sm:$0xff] %vm446_vm3, %v420_v9  ;;  %v422_v22 = vsel %vm358_vm12, %v326_v7, %v390_v16  ;;  %vm361_vm15 = vcmp.ge.f32.partialorder %v329_v11, 0.0  ;;  %v393_v24 = vmul.f32 0.01, %v329_v11  ;;  %vm362_vm0 = vcmp.ge.f32.partialorder %v330_v12, 0.0  ;;  %v275_v7 = vld [vmem:[%s767_s13 + $0xd8] sm:$0xff] }
  0x42   : > { %454 = vst.msk [vmem:[%s818_s26 + $0x38] sm:$0xff] %vm446_vm3, %v421_v15  ;;  %v423_v26 = vsel %vm359_vm13, %v327_v8, %v391_v19  ;;  %v424_v27 = vsel %vm360_vm14, %v328_v10, %v392_v20  ;;  %v394_v28 = vmul.f32 0.01, %v330_v12  ;;  %vm363_vm1 = vcmp.ge.f32.partialorder %v331_v21, 0.0  ;;  %v276_v8 = vld [vmem:[%s767_s13 + $0xe0] sm:$0xff] }
  0x43   : > { %455 = vst.msk [vmem:[%s818_s26 + $0x40] sm:$0xff] %vm446_vm3, %v422_v22  ;;  %v425_v30 = vsel %vm361_vm15, %v329_v11, %v393_v24  ;;  %v395_v31 = vmul.f32 0.01, %v331_v21  ;;  %v297_v32 = vmul.f32 %v780_v23, %v262_v13  ;;  %v298_v33 = vmul.f32 %v780_v23, %v263_v14 }
  0x44   : > { %456 = vst.msk [vmem:[%s818_s26 + $0x48] sm:$0xff] %vm446_vm3, %v423_v26  ;;  %v426_v35 = vsel %vm362_vm0, %v330_v12, %v394_v28  ;;  %v299_v36 = vmul.f32 %v780_v23, %v264_v17  ;;  %v300_v37 = vmul.f32 %v780_v23, %v265_v18  ;;  %v301_v38 = vmul.f32 %v780_v23, %v266_v25 }
  0x45   : > { %457 = vst.msk [vmem:[%s818_s26 + $0x50] sm:$0xff] %vm446_vm3, %v424_v27  ;;  %v427_v39 = vsel %vm363_vm1, %v331_v21, %v395_v31  ;;  %v332_v40 = vadd.f32 %v801_v41, %v297_v32  ;;  %v333_v42 = vadd.f32 %v801_v41, %v298_v33  ;;  %v302_v43 = vmul.f32 %v780_v23, %v267_v29  ;;  %v277_v29 = vld [vmem:[%s767_s13 + $0xe8] sm:$0xff] }
  0x46   : > { %458 = vst.msk [vmem:[%s818_s26 + $0x58] sm:$0xff] %vm446_vm3, %v425_v30  ;;  %v334_v44 = vadd.f32 %v801_v41, %v299_v36  ;;  %v335_v45 = vadd.f32 %v801_v41, %v300_v37  ;;  %v336_v46 = vadd.f32 %v801_v41, %v301_v38  ;;  %v303_v47 = vmul.f32 %v780_v23, %v268_v34  ;;  %v278_v34 = vld [vmem:[%s767_s13 + $0xf0] sm:$0xff] }
  0x47   : > { %459 = vst.msk [vmem:[%s818_s26 + $0x60] sm:$0xff] %vm446_vm3, %v426_v35  ;;  %vm364_vm2 = vcmp.ge.f32.partialorder %v332_v40, 0.0  ;;  %v396_v48 = vmul.f32 0.01, %v332_v40  ;;  %vm365_vm4 = vcmp.ge.f32.partialorder %v333_v42, 0.0  ;;  %v337_v49 = vadd.f32 %v801_v41, %v302_v43  ;;  %v279_v35 = vld [vmem:[%s767_s13 + $0xf8] sm:$0xff] }
  0x48   : > { %460 = vst.msk [vmem:[%s818_s26 + $0x68] sm:$0xff] %vm446_vm3, %v427_v39  ;;  %v397_v52 = vmul.f32 0.01, %v333_v42  ;;  %vm366_vm5 = vcmp.ge.f32.partialorder %v334_v44, 0.0  ;;  %v398_v53 = vmul.f32 0.01, %v334_v44  ;;  %v338_v54 = vadd.f32 %v801_v41, %v303_v47 }
  0x49   : > { %v428_v55 = vsel %vm364_vm2, %v332_v40, %v396_v48  ;;  %vm367_vm6 = vcmp.ge.f32.partialorder %v335_v45, 0.0  ;;  %v399_v56 = vmul.f32 0.01, %v335_v45  ;;  %vm368_vm7 = vcmp.ge.f32.partialorder %v336_v46, 0.0 }
  0x4a   : > { %461 = vst.msk [vmem:[%s818_s26 + $0x70] sm:$0xff] %vm446_vm3, %v428_v55  ;;  %v429_v59 = vsel %vm365_vm4, %v333_v42, %v397_v52  ;;  %v430_v60 = vsel %vm366_vm5, %v334_v44, %v398_v53  ;;  %v400_v61 = vmul.f32 0.01, %v336_v46  ;;  %vm369_vm8 = vcmp.ge.f32.partialorder %v337_v49, 0.0 }
  0x4b   : > { %462 = vst.msk [vmem:[%s818_s26 + $0x78] sm:$0xff] %vm446_vm3, %v429_v59  ;;  %v431_v0 = vsel %vm367_vm6, %v335_v45, %v399_v56  ;;  %v401_v1 = vmul.f32 0.01, %v337_v49  ;;  %vm370_vm9 = vcmp.ge.f32.partialorder %v338_v54, 0.0  ;;  %v402_v2 = vmul.f32 0.01, %v338_v54 }
  0x4c   : > { %463 = vst.msk [vmem:[%s818_s26 + $0x80] sm:$0xff] %vm446_vm3, %v430_v60  ;;  %v432_v3 = vsel %vm368_vm7, %v336_v46, %v400_v61  ;;  %v304_v4 = vmul.f32 %v780_v23, %v269_v50  ;;  %v305_v5 = vmul.f32 %v780_v23, %v270_v51  ;;  %v306_v6 = vmul.f32 %v780_v23, %v271_v57 }
  0x4d   : > { %464 = vst.msk [vmem:[%s818_s26 + $0x88] sm:$0xff] %vm446_vm3, %v431_v0  ;;  %v433_v9 = vsel %vm369_vm8, %v337_v49, %v401_v1  ;;  %v434_v10 = vsel %vm370_vm9, %v338_v54, %v402_v2  ;;  %v307_v11 = vmul.f32 %v780_v23, %v272_v58  ;;  %v308_v12 = vmul.f32 %v780_v23, %v273_v62 }
  0x4e   : > { %465 = vst.msk [vmem:[%s818_s26 + $0x90] sm:$0xff] %vm446_vm3, %v432_v3  ;;  %v339_v13 = vadd.f32 %v801_v41, %v304_v4  ;;  %v340_v14 = vadd.f32 %v801_v41, %v305_v5  ;;  %v341_v15 = vadd.f32 %v801_v41, %v306_v6  ;;  %v309_v16 = vmul.f32 %v780_v23, %v274_v63 }
  0x4f   : > { %466 = vst.msk [vmem:[%s818_s26 + $0x98] sm:$0xff] %vm446_vm3, %v433_v9  ;;  %v342_v17 = vadd.f32 %v801_v41, %v307_v11  ;;  %v343_v18 = vadd.f32 %v801_v41, %v308_v12  ;;  %v310_v19 = vmul.f32 %v780_v23, %v275_v7  ;;  %v311_v20 = vmul.f32 %v780_v23, %v276_v8 }
  0x50   : > { %467 = vst.msk [vmem:[%s818_s26 + $0xa0] sm:$0xff] %vm446_vm3, %v434_v10  ;;  %vm371_vm10 = vcmp.ge.f32.partialorder %v339_v13, 0.0  ;;  %v403_v21 = vmul.f32 0.01, %v339_v13  ;;  %vm372_vm11 = vcmp.ge.f32.partialorder %v340_v14, 0.0  ;;  %vm373_vm12 = vcmp.ge.f32.partialorder %v341_v15, 0.0 }
  0x51   : > { %v404_v22 = vmul.f32 0.01, %v340_v14  ;;  %v405_v24 = vmul.f32 0.01, %v341_v15  ;;  %vm374_vm13 = vcmp.ge.f32.partialorder %v342_v17, 0.0  ;;  %vm375_vm14 = vcmp.ge.f32.partialorder %v343_v18, 0.0 }
  0x52   : > { %v435_v25 = vsel %vm371_vm10, %v339_v13, %v403_v21  ;;  %v406_v26 = vmul.f32 0.01, %v342_v17  ;;  %v407_v27 = vmul.f32 0.01, %v343_v18  ;;  %v344_v28 = vadd.f32 %v801_v41, %v309_v16 }
  0x53   : > { %468 = vst.msk [vmem:[%s818_s26 + $0xa8] sm:$0xff] %vm446_vm3, %v435_v25  ;;  %v436_v30 = vsel %vm372_vm11, %v340_v14, %v404_v22  ;;  %v437_v31 = vsel %vm373_vm12, %v341_v15, %v405_v24  ;;  %v345_v32 = vadd.f32 %v801_v41, %v310_v19  ;;  %v346_v33 = vadd.f32 %v801_v41, %v311_v20 }
  0x54   : > { %469 = vst.msk [vmem:[%s818_s26 + $0xb0] sm:$0xff] %vm446_vm3, %v436_v30  ;;  %v438_v36 = vsel %vm374_vm13, %v342_v17, %v406_v26  ;;  %v439_v37 = vsel %vm375_vm14, %v343_v18, %v407_v27  ;;  %vm376_vm15 = vcmp.ge.f32.partialorder %v344_v28, 0.0  ;;  %v408_v38 = vmul.f32 0.01, %v344_v28 }
  0x55   : > { %470 = vst.msk [vmem:[%s818_s26 + $0xb8] sm:$0xff] %vm446_vm3, %v437_v31  ;;  %vm377_vm0 = vcmp.ge.f32.partialorder %v345_v32, 0.0  ;;  %v409_v39 = vmul.f32 0.01, %v345_v32  ;;  %vm378_vm1 = vcmp.ge.f32.partialorder %v346_v33, 0.0  ;;  %v312_v40 = vmul.f32 %v780_v23, %v277_v29 }
  0x56   : > { %471 = vst.msk [vmem:[%s818_s26 + $0xc0] sm:$0xff] %vm446_vm3, %v438_v36  ;;  %v440_v42 = vsel %vm376_vm15, %v344_v28, %v408_v38  ;;  %v410_v43 = vmul.f32 0.01, %v346_v33  ;;  %v313_v44 = vmul.f32 %v780_v23, %v278_v34  ;;  %v314_v45 = vmul.f32 %v780_v23, %v279_v35 }
  0x57   : > { %472 = vst.msk [vmem:[%s818_s26 + $0xc8] sm:$0xff] %vm446_vm3, %v439_v37  ;;  %v441_v46 = vsel %vm377_vm0, %v345_v32, %v409_v39  ;;  %v347_v47 = vadd.f32 %v801_v41, %v312_v40 }
  0x58   : > { %473 = vst.msk [vmem:[%s818_s26 + $0xd0] sm:$0xff] %vm446_vm3, %v440_v42  ;;  %v442_v48 = vsel %vm378_vm1, %v346_v33, %v410_v43  ;;  %v348_v49 = vadd.f32 %v801_v41, %v313_v44  ;;  %v349_v50 = vadd.f32 %v801_v41, %v314_v45 }
  0x59   : > { %474 = vst.msk [vmem:[%s818_s26 + $0xd8] sm:$0xff] %vm446_vm3, %v441_v46  ;;  %vm379_vm2 = vcmp.ge.f32.partialorder %v347_v47, 0.0  ;;  %v411_v23 = vmul.f32 0.01, %v347_v47 }
  0x5a   : > { %475 = vst.msk [vmem:[%s818_s26 + $0xe0] sm:$0xff] %vm446_vm3, %v442_v48  ;;  %vm380_vm4 = vcmp.ge.f32.partialorder %v348_v49, 0.0  ;;  %v412_v51 = vmul.f32 0.01, %v348_v49  ;;  %vm381_vm5 = vcmp.ge.f32.partialorder %v349_v50, 0.0 }
  0x5b   : > { %v443_v52 = vsel %vm379_vm2, %v347_v47, %v411_v23  ;;  %v413_v53 = vmul.f32 0.01, %v349_v50 }
  0x5c   : > { %476 = vst.msk [vmem:[%s818_s26 + $0xe8] sm:$0xff] %vm446_vm3, %v443_v52  ;;  %v444_v41 = vsel %vm380_vm4, %v348_v49, %v412_v51 }
  0x5d   : > { %477 = vst.msk [vmem:[%s818_s26 + $0xf0] sm:$0xff] %vm446_vm3, %v444_v41  ;;  %v445_v54 = vsel %vm381_vm5, %v349_v50, %v413_v53 }
  0x5e   : > { %478 = vst.msk [vmem:[%s818_s26 + $0xf8] sm:$0xff] %vm446_vm3, %v445_v54 }
  0x5f   : > { %640 = shalt.err (!%p637_p3)
}
  0x60   : > { %s677_s23 = smov 128   ;;  %s678_s25 = smov 8  }
  0x61   : > { %570 = dma.vmem_to_hbm [thread:$0]  (%p747_p5), %s493_s8, 4096, %s495_s9, %s480_s10, %s677_s23, %s677_s23, %s678_s25  }
  0x62 PF: > { %p576_p4 = scmp.ge.s32.totalorder %s675_s21, 2  ;;  %s509_s26 = sand.u32 1, %s663_s18  }
  0x63   : > { %s510_s30 = scalar_lea.sflag [#allocation3], %s509_s26 }
  0x64   : > { %p573_p7 = pnand %p576_p4, %p751_p6 }
  0x66   : > { %p574_p8 = pneg %p573_p7 }
  0x68   : > { %658 = dma.done.wait (%p574_p8), %s510_s30, 4096  }
  0x69   : > { %660 = vsyncadd (%p574_p8), %s510_s30, 4294963200  ;;  %p15_p9 = scmp.ge.s32.totalorder %s734_s24, 4   ;;  %s991_s18 = smov %s667_s19 }
  0x6a   : > { %s992_s19 = smov %s671_s20  ;;  %s993_s20 = smov %s745_s27 }
  0x6b   : > { %s994_s21 = smov %s734_s24  ;;  %17 = sbr.rel (!%p15_p9) target bundleno = 3 (0x3), region = 75 }
  0x70   :  { %516 = vsyncpa [#allocation3], 1 }
  0x71   :  { %518 = vsyncpa [#allocation3 + $0x1], 1 }

// kernel: basic_conv2d.2
= control target key start
LH: loop header
LB: loop body
LE: loop exit
PB: predicated region body
PF: predicated region fallthrough
CT: control target
= control target key end

     0   :  { %s926_s15 = smov 0   ;;  %s1310_s0 = inlined_call_operand.vmem [shape: bf16[512,36], index: 0, kind: input, shape index: {}]   ;;  %s1311_s1 = inlined_call_operand.vmem [shape: bf16[36,32], index: 1, kind: input, shape index: {}]   ;;  %s1312_s2 = inlined_call_operand.vmem [shape: f32[512,32], index: 2, kind: output, shape index: {0}]   ;;  %s1313_s3 = inlined_call_operand.vmem [shape: f32[1,32], index: 3, kind: output, shape index: {1}]   ;;  %s1314_s4 = inlined_call_operand.vmem [shape: f32[1,32], index: 4, kind: output, shape index: {2}]  }
   0x1 LB: > { %s756_s16 = sadd.s32 4294967295, %s898_s15   ;;  %p760_p0 = scmp.ge.s32.totalorder %s898_s15, 1  ;;  %s898_s15 = sphi %s926_s15, %s15_s15  }
   0x2   : > { %p158_p1 = scmp.lt.s32.totalorder %s898_s15, 3 }
   0x4   : > { %p159_p2 = pnand %p760_p0, %p158_p1 }
   0x5   : > { %s761_s19 = sshll.u32 (!%p159_p2), %s756_s16, 5  ;;  %p853_p4 = scmp.ne.s32.totalorder (!%p159_p2), %s756_s16, 0 }
   0x6   : > { %162 = sbr.rel (%p159_p2) target bundleno = 304 (0x130), region = 28  ;;  %p185_p3 = scmp.lt.s32.totalorder (!%p159_p2), %s761_s19, 63 }
   0xb   : > { %v233_v0 = vld [vmem:[%s1311_s1 + $0x10] sm:$0x3]  ;;  %vm378_vm0 = vcmask 1041408   ;;  %s1316_s19 = smov (!%p185_p3, %s761_s19), 63  ;;  %v873_v4 = vld [vmem:[%s1311_s1 + $0x8] sm:$0xff]  ;;  %v872_v5 = vld [vmem:[%s1311_s1] sm:$0xff] }
   0xc   : > { %v323_v1 = vunpack.c.l.b16 %v233_v0  ;;  %s762_s22 = sshll.u32 %s1316_s19, 2  ;;  %vm329_vm1 = vcmask 293888   ;;  %s764_s28 = sshll.u32 %s1316_s19, 3  ;;  %vm471_vm2 = vcmask 261120  }
   0xd   : > { %s951_s27 = scalar_lea.vmem %s1310_s0, %s762_s22  ;;  %s989_s5 = scalar_lea.vmem %s1312_s2, %s764_s28 }
   0xe   : > { %v326_v2 = vpack.c.b16 %v323_v1, %v323_v1  ;;  %v856_v6 = vld [vmem:[%s951_s27] sm:$0xff]  ;;  %v857_v10 = vld [vmem:[%s951_s27 + $0x8] sm:$0xff]  ;;  %v858_v14 = vld [vmem:[%s951_s27 + $0x10] sm:$0xff] }
   0xf   : > { %v860_v7 = vld [vmem:[%s951_s27 + $0x20] sm:$0xff]  ;;  %v861_v11 = vld [vmem:[%s951_s27 + $0x28] sm:$0xff]  ;;  %v862_v15 = vld [vmem:[%s951_s27 + $0x30] sm:$0xff] }
  0x10   : > { %v380_v3 = vsel %vm378_vm0, %v326_v2, 0  ;;  %v864_v8 = vld [vmem:[%s951_s27 + $0x40] sm:$0xff]  ;;  %v865_v12 = vld [vmem:[%s951_s27 + $0x48] sm:$0xff]  ;;  %v866_v16 = vld [vmem:[%s951_s27 + $0x50] sm:$0xff] }
  0x11   : > { %387 = vmatpush.bf16.msra.mxu0 %v380_v3  ;;  %874 = vmatpush.bf16.msra.mxu1 %v380_v3  ;;  %v868_v9 = vld [vmem:[%s951_s27 + $0x60] sm:$0xff]  ;;  %v869_v13 = vld [vmem:[%s951_s27 + $0x68] sm:$0xff]  ;;  %v870_v17 = vld [vmem:[%s951_s27 + $0x70] sm:$0xff] }
  0x12   : > { %875 = vmatpush.bf16.msra.mxu2 %v380_v3  ;;  %876 = vmatpush.bf16.msra.mxu3 %v380_v3  ;;  %v859_v18 = vld [vmem:[%s951_s27 + $0x18] sm:$0xff] }
  0x13   : > { %v863_v19 = vld [vmem:[%s951_s27 + $0x38] sm:$0xff] }
  0x14   : > { %v867_v20 = vld [vmem:[%s951_s27 + $0x58] sm:$0xff] }
  0x15   : > { %388 = vmatpush.bf16.msra.mxu0 %v873_v4  ;;  %877 = vmatpush.bf16.msra.mxu1 %v873_v4  ;;  %v871_v21 = vld [vmem:[%s951_s27 + $0x78] sm:$0xff] }
  0x16   : > { %878 = vmatpush.bf16.msra.mxu2 %v873_v4  ;;  %879 = vmatpush.bf16.msra.mxu3 %v873_v4 }
  0x19   : > { %389 = vmatpush.bf16.msra.mxu0 %v872_v5  ;;  %880 = vmatpush.bf16.msra.mxu1 %v872_v5 }
  0x1a   : > { %881 = vmatpush.bf16.msra.mxu2 %v872_v5  ;;  %882 = vmatpush.bf16.msra.mxu3 %v872_v5 }
  0x1c   : > { %837 = vmatmul.msk.bf16.vlgmr.msra.gmra.mxu0 %vm329_vm1, %v856_v6  ;;  %841 = vmatmul.msk.bf16.vlgmr.msra.gmra.mxu1 %vm329_vm1, %v860_v7 }
  0x1d   : > { %845 = vmatmul.msk.bf16.vlgmr.msra.gmra.mxu2 %vm329_vm1, %v864_v8  ;;  %849 = vmatmul.msk.bf16.vlgmr.msra.gmra.mxu3 %vm329_vm1, %v868_v9 }
  0x2c   : > { %838 = vmatmul.msk.bf16.gmra.mxu0 %vm329_vm1, %v857_v10  ;;  %842 = vmatmul.msk.bf16.gmra.mxu1 %vm329_vm1, %v861_v11 }
  0x2d   : > { %846 = vmatmul.msk.bf16.gmra.mxu2 %vm329_vm1, %v865_v12  ;;  %850 = vmatmul.msk.bf16.gmra.mxu3 %vm329_vm1, %v869_v13 }
  0x3c   : > { %839 = vmatmul.msk.bf16.gmra.mxu0 %vm329_vm1, %v858_v14  ;;  %843 = vmatmul.msk.bf16.gmra.mxu1 %vm329_vm1, %v862_v15 }
  0x3d   : > { %847 = vmatmul.msk.bf16.gmra.mxu2 %vm329_vm1, %v866_v16  ;;  %851 = vmatmul.msk.bf16.gmra.mxu3 %vm329_vm1, %v870_v17 }
  0x4c   : > { %840 = vmatmul.msk.bf16.gmra.mxu0 %vm329_vm1, %v859_v18  ;;  %844 = vmatmul.msk.bf16.gmra.mxu1 %vm329_vm1, %v863_v19 }
  0x4d   : > { %848 = vmatmul.msk.bf16.gmra.mxu2 %vm329_vm1, %v867_v20  ;;  %852 = vmatmul.msk.bf16.gmra.mxu3 %vm329_vm1, %v871_v21 }
  0x99   : > { %v991_v22 = vpop.f32.mrf.mxu0  ;;  %v993_v23 = vpop.f32.mrf.mxu1 }
  0x9a   : > { %472 = vst.msk [vmem:[%s989_s5] sm:$0xff] %vm471_vm2, %v991_v22 }
  0x9b   : > { %480 = vst.msk [vmem:[%s989_s5 + $0x40] sm:$0xff] %vm471_vm2, %v993_v23 }
  0xa0   : > { %v1001_v24 = vpop.f32.mrf.mxu2  ;;  %v1003_v25 = vpop.f32.mrf.mxu3 }
  0xa1   : > { %488 = vst.msk [vmem:[%s989_s5 + $0x80] sm:$0xff] %vm471_vm2, %v1001_v24  ;;  %v1008_v26 = vpop.f32.mrf.mxu0  ;;  %v1010_v27 = vpop.f32.mrf.mxu1 }
  0xa2   : > { %496 = vst.msk [vmem:[%s989_s5 + $0xc0] sm:$0xff] %vm471_vm2, %v1003_v25 }
  0xa3   : > { %473 = vst.msk [vmem:[%s989_s5 + $0x8] sm:$0xff] %vm471_vm2, %v1008_v26 }
  0xa4   : > { %481 = vst.msk [vmem:[%s989_s5 + $0x48] sm:$0xff] %vm471_vm2, %v1010_v27 }
  0xa8   : > { %v1021_v28 = vpop.f32.mrf.mxu2  ;;  %v1023_v29 = vpop.f32.mrf.mxu3 }
  0xa9   : > { %489 = vst.msk [vmem:[%s989_s5 + $0x88] sm:$0xff] %vm471_vm2, %v1021_v28  ;;  %v1028_v30 = vpop.f32.mrf.mxu0  ;;  %v1030_v31 = vpop.f32.mrf.mxu1 }
  0xaa   : > { %497 = vst.msk [vmem:[%s989_s5 + $0xc8] sm:$0xff] %vm471_vm2, %v1023_v29 }
  0xab   : > { %474 = vst.msk [vmem:[%s989_s5 + $0x10] sm:$0xff] %vm471_vm2, %v1028_v30 }
  0xac   : > { %482 = vst.msk [vmem:[%s989_s5 + $0x50] sm:$0xff] %vm471_vm2, %v1030_v31 }
  0xb0   : > { %v1041_v32 = vpop.f32.mrf.mxu2  ;;  %v1043_v33 = vpop.f32.mrf.mxu3 }
  0xb1   : > { %490 = vst.msk [vmem:[%s989_s5 + $0x90] sm:$0xff] %vm471_vm2, %v1041_v32  ;;  %v1048_v34 = vpop.f32.mrf.mxu0  ;;  %v1050_v35 = vpop.f32.mrf.mxu1 }
  0xb2   : > { %498 = vst.msk [vmem:[%s989_s5 + $0xd0] sm:$0xff] %vm471_vm2, %v1043_v33 }
  0xb3   : > { %475 = vst.msk [vmem:[%s989_s5 + $0x18] sm:$0xff] %vm471_vm2, %v1048_v34 }
  0xb4   : > { %483 = vst.msk [vmem:[%s989_s5 + $0x58] sm:$0xff] %vm471_vm2, %v1050_v35 }
  0xb8   : > { %v1061_v36 = vpop.f32.mrf.mxu2  ;;  %v1063_v37 = vpop.f32.mrf.mxu3 }
  0xb9   : > { %491 = vst.msk [vmem:[%s989_s5 + $0x98] sm:$0xff] %vm471_vm2, %v1061_v36  ;;  %v401_v38 = vpop.f32.mrf.mxu0  ;;  %v1068_v39 = vpop.f32.mrf.mxu1 }
  0xba   : > { %499 = vst.msk [vmem:[%s989_s5 + $0xd8] sm:$0xff] %vm471_vm2, %v1063_v37 }
  0xbb   : > { %476 = vst.msk [vmem:[%s989_s5 + $0x20] sm:$0xff] %vm471_vm2, %v401_v38 }
  0xbc   : > { %484 = vst.msk [vmem:[%s989_s5 + $0x60] sm:$0xff] %vm471_vm2, %v1068_v39 }
  0xc0   : > { %v1078_v40 = vpop.f32.mrf.mxu2  ;;  %v1080_v41 = vpop.f32.mrf.mxu3 }
  0xc1   : > { %492 = vst.msk [vmem:[%s989_s5 + $0xa0] sm:$0xff] %vm471_vm2, %v1078_v40  ;;  %v403_v42 = vpop.f32.mrf.mxu0  ;;  %v1085_v43 = vpop.f32.mrf.mxu1 }
  0xc2   : > { %500 = vst.msk [vmem:[%s989_s5 + $0xe0] sm:$0xff] %vm471_vm2, %v1080_v41 }
  0xc3   : > { %477 = vst.msk [vmem:[%s989_s5 + $0x28] sm:$0xff] %vm471_vm2, %v403_v42 }
  0xc4   : > { %485 = vst.msk [vmem:[%s989_s5 + $0x68] sm:$0xff] %vm471_vm2, %v1085_v43 }
  0xc8   : > { %v1095_v44 = vpop.f32.mrf.mxu2  ;;  %v1097_v45 = vpop.f32.mrf.mxu3 }
  0xc9   : > { %493 = vst.msk [vmem:[%s989_s5 + $0xa8] sm:$0xff] %vm471_vm2, %v1095_v44  ;;  %v406_v46 = vpop.f32.mrf.mxu0  ;;  %v1102_v47 = vpop.f32.mrf.mxu1 }
  0xca   : > { %501 = vst.msk [vmem:[%s989_s5 + $0xe8] sm:$0xff] %vm471_vm2, %v1097_v45 }
  0xcb   : > { %478 = vst.msk [vmem:[%s989_s5 + $0x30] sm:$0xff] %vm471_vm2, %v406_v46 }
  0xcc   : > { %486 = vst.msk [vmem:[%s989_s5 + $0x70] sm:$0xff] %vm471_vm2, %v1102_v47 }
  0xd0   : > { %v1112_v48 = vpop.f32.mrf.mxu2  ;;  %v1114_v49 = vpop.f32.mrf.mxu3 }
  0xd1   : > { %494 = vst.msk [vmem:[%s989_s5 + $0xb0] sm:$0xff] %vm471_vm2, %v1112_v48  ;;  %v408_v50 = vpop.f32.mrf.mxu0  ;;  %v1119_v51 = vpop.f32.mrf.mxu1 }
  0xd2   : > { %502 = vst.msk [vmem:[%s989_s5 + $0xf0] sm:$0xff] %vm471_vm2, %v1114_v49 }
  0xd3   : > { %479 = vst.msk [vmem:[%s989_s5 + $0x38] sm:$0xff] %vm471_vm2, %v408_v50 }
  0xd4   : > { %487 = vst.msk [vmem:[%s989_s5 + $0x78] sm:$0xff] %vm471_vm2, %v1119_v51 }
  0xd6   : > { %507 = sbr.rel (%p853_p4) target bundleno = 222 (0xde), region = 32 }
  0xd8   : > { %v1129_v52 = vpop.f32.mrf.mxu2  ;;  %v1131_v53 = vpop.f32.mrf.mxu3 }
  0xd9   : > { %495 = vst.msk [vmem:[%s989_s5 + $0xb8] sm:$0xff] %vm471_vm2, %v1129_v52 }
  0xda   : > { %503 = vst.msk [vmem:[%s989_s5 + $0xf8] sm:$0xff] %vm471_vm2, %v1131_v53 }
  0xdb   : > { %vm508_vm3 = vcmask 253952   ;;  %v900_v54 = vmov 0.0  }
  0xdc   : > { %509 = vst.msk [vmem:[%s1313_s3] sm:$0x1] %vm508_vm3, %v900_v54 }
  0xdd   : > { %510 = vst.msk [vmem:[%s1314_s4] sm:$0x1] %vm508_vm3, %v900_v54 }
  0xde PF: > { %v512_v55 = vsel %vm471_vm2, %v991_v22, 0.0  ;;  %v513_v56 = vsel %vm471_vm2, %v1008_v26, 0.0  ;;  %v515_v57 = vsel %vm471_vm2, %v1028_v30, 0.0  ;;  %v517_v59 = vsel %vm471_vm2, %v1048_v34, 0.0 }
  0xdf   : > { %v514_v58 = vadd.f32 %v513_v56, %v512_v55  ;;  %v519_v61 = vsel %vm471_vm2, %v401_v38, 0.0  ;;  %v521_v63 = vsel %vm471_vm2, %v403_v42, 0.0  ;;  %v523_v1 = vsel %vm471_vm2, %v406_v46, 0.0 }
  0xe0   : > { %v585_v2 = vmul.f32 %v991_v22, %v991_v22  ;;  %v586_v4 = vmul.f32 %v1008_v26, %v1008_v26  ;;  %v587_v5 = vmul.f32 %v1028_v30, %v1028_v30  ;;  %v525_v6 = vsel %vm471_vm2, %v408_v50, 0.0 }
  0xe1   : > { %v516_v60 = vadd.f32 %v515_v57, %v514_v58  ;;  %v588_v8 = vmul.f32 %v1048_v34, %v1048_v34  ;;  %v527_v9 = vsel %vm471_vm2, %v993_v23, 0.0  ;;  %v589_v12 = vmul.f32 %v401_v38, %v401_v38 }
  0xe2   : > { %v617_v10 = vsel %vm471_vm2, %v585_v2, 0.0  ;;  %v618_v13 = vsel %vm471_vm2, %v586_v4, 0.0  ;;  %v620_v14 = vsel %vm471_vm2, %v587_v5, 0.0  ;;  %v529_v15 = vsel %vm471_vm2, %v1010_v27, 0.0 }
  0xe3   : > { %v518_v62 = vadd.f32 %v517_v59, %v516_v60  ;;  %v619_v16 = vadd.f32 %v618_v13, %v617_v10  ;;  %v590_v18 = vmul.f32 %v403_v42, %v403_v42  ;;  %v622_v19 = vsel %vm471_vm2, %v588_v8, 0.0 }
  0xe4   : > { %v531_v20 = vsel %vm471_vm2, %v1030_v31, 0.0  ;;  %v591_v26 = vmul.f32 %v406_v46, %v406_v46  ;;  %v624_v30 = vsel %vm471_vm2, %v589_v12, 0.0  ;;  %v533_v34 = vsel %vm471_vm2, %v1050_v35, 0.0 }
  0xe5   : > { %v520_v0 = vadd.f32 %v519_v61, %v518_v62  ;;  %v621_v21 = vadd.f32 %v620_v14, %v619_v16  ;;  %v592_v55 = vmul.f32 %v408_v50, %v408_v50  ;;  %v626_v56 = vsel %vm471_vm2, %v590_v18, 0.0 }
  0xe6   : > { %v535_v42 = vsel %vm471_vm2, %v1068_v39, 0.0  ;;  %v593_v59 = vmul.f32 %v993_v23, %v993_v23  ;;  %v628_v46 = vsel %vm471_vm2, %v591_v26, 0.0  ;;  %v537_v60 = vsel %vm471_vm2, %v1085_v43, 0.0 }
  0xe7   : > { %v522_v3 = vadd.f32 %v521_v63, %v520_v0  ;;  %v623_v38 = vadd.f32 %v622_v19, %v621_v21  ;;  %v594_v50 = vmul.f32 %v1010_v27, %v1010_v27  ;;  %v630_v63 = vsel %vm471_vm2, %v592_v55, 0.0 }
  0xe8   : > { %v539_v0 = vsel %vm471_vm2, %v1102_v47, 0.0  ;;  %v595_v23 = vmul.f32 %v1030_v31, %v1030_v31  ;;  %v541_v4 = vsel %vm471_vm2, %v1119_v51, 0.0  ;;  %v596_v27 = vmul.f32 %v1050_v35, %v1050_v35 }
  0xe9   : > { %v524_v7 = vadd.f32 %v523_v1, %v522_v3  ;;  %v625_v57 = vadd.f32 %v624_v30, %v623_v38  ;;  %v632_v3 = vsel %vm471_vm2, %v593_v59, 0.0  ;;  %v543_v8 = vsel %vm471_vm2, %v1001_v24, 0.0 }
  0xea   : > { %v597_v31 = vmul.f32 %v1068_v39, %v1068_v39  ;;  %v545_v12 = vsel %vm471_vm2, %v1021_v28, 0.0  ;;  %v598_v35 = vmul.f32 %v1085_v43, %v1085_v43  ;;  %v547_v16 = vsel %vm471_vm2, %v1041_v32, 0.0 }
  0xeb   : > { %v526_v11 = vadd.f32 %v525_v6, %v524_v7  ;;  %v627_v61 = vadd.f32 %v626_v56, %v625_v57  ;;  %v634_v7 = vsel %vm471_vm2, %v594_v50, 0.0  ;;  %v599_v39 = vmul.f32 %v1102_v47, %v1102_v47 }
  0xec   : > { %v640_v19 = vsel %vm471_vm2, %v597_v31, 0.0  ;;  %v600_v43 = vmul.f32 %v1119_v51, %v1119_v51  ;;  %v642_v26 = vsel %vm471_vm2, %v598_v35, 0.0  ;;  %v551_v30 = vsel %vm471_vm2, %v1078_v40, 0.0 }
  0xed   : > { %v528_v17 = vadd.f32 %v527_v9, %v526_v11  ;;  %v629_v1 = vadd.f32 %v628_v46, %v627_v61  ;;  %v636_v11 = vsel %vm471_vm2, %v595_v23, 0.0  ;;  %v601_v47 = vmul.f32 %v1001_v24, %v1001_v24 }
  0xee   : > { %v553_v55 = vsel %vm471_vm2, %v1095_v44, 0.0  ;;  %v602_v51 = vmul.f32 %v1021_v28, %v1021_v28  ;;  %v646_v57 = vsel %vm471_vm2, %v600_v43, 0.0  ;;  %v603_v24 = vmul.f32 %v1041_v32, %v1041_v32 }
  0xef   : > { %v530_v22 = vadd.f32 %v529_v15, %v528_v17  ;;  %v631_v5 = vadd.f32 %v630_v63, %v629_v1  ;;  %v638_v15 = vsel %vm471_vm2, %v596_v27, 0.0  ;;  %v557_v61 = vsel %vm471_vm2, %v1129_v52, 0.0 }
  0xf0   : > { %v604_v28 = vmul.f32 %v1061_v36, %v1061_v36  ;;  %v650_v63 = vsel %vm471_vm2, %v602_v51, 0.0  ;;  %v605_v32 = vmul.f32 %v1078_v40, %v1078_v40  ;;  %v652_v23 = vsel %vm471_vm2, %v603_v24, 0.0 }
  0xf1   : > { %v532_v54 = vadd.f32 %v531_v20, %v530_v22  ;;  %v633_v9 = vadd.f32 %v632_v3, %v631_v5  ;;  %v549_v20 = vsel %vm471_vm2, %v1061_v36, 0.0  ;;  %v561_v3 = vsel %vm471_vm2, %v1023_v29, 0.0 }
  0xf2   : > { %v606_v36 = vmul.f32 %v1095_v44, %v1095_v44  ;;  %v563_v27 = vsel %vm471_vm2, %v1043_v33, 0.0  ;;  %v607_v40 = vmul.f32 %v1112_v48, %v1112_v48  ;;  %v608_v44 = vmul.f32 %v1129_v52, %v1129_v52 }
  0xf3   : > { %v534_v58 = vadd.f32 %v533_v34, %v532_v54  ;;  %v635_v13 = vadd.f32 %v634_v7, %v633_v9  ;;  %v644_v54 = vsel %vm471_vm2, %v599_v39, 0.0  ;;  %v656_v9 = vsel %vm471_vm2, %v605_v32, 0.0 }
  0xf4   : > { %v610_v52 = vmul.f32 %v1023_v29, %v1023_v29  ;;  %v662_v39 = vsel %vm471_vm2, %v608_v44, 0.0  ;;  %v573_v43 = vsel %vm471_vm2, %v1131_v53, 0.0  ;;  %v612_v29 = vmul.f32 %v1063_v37, %v1063_v37 }
  0xf5   : > { %v536_v62 = vadd.f32 %v535_v42, %v534_v58  ;;  %v637_v17 = vadd.f32 %v636_v11, %v635_v13  ;;  %v555_v58 = vsel %vm471_vm2, %v1112_v48, 0.0  ;;  %v567_v13 = vsel %vm471_vm2, %v1080_v41, 0.0 }
  0xf6   : > { %v609_v48 = vmul.f32 %v1003_v25, %v1003_v25  ;;  %v670_v51 = vsel %vm471_vm2, %v612_v29, 0.0  ;;  %vm582_vm4 = vcmask 253952  }
  0xf7   : > { %v538_v2 = vadd.f32 %v537_v60, %v536_v62  ;;  %v639_v21 = vadd.f32 %v638_v15, %v637_v17  ;;  %v648_v60 = vsel %vm471_vm2, %v601_v47, 0.0  ;;  %v660_v15 = vsel %vm471_vm2, %v607_v40, 0.0 }
  0xf9   : > { %v540_v6 = vadd.f32 %v539_v0, %v538_v2  ;;  %v641_v34 = vadd.f32 %v640_v19, %v639_v21  ;;  %v559_v0 = vsel %vm471_vm2, %v1003_v25, 0.0  ;;  %v571_v19 = vsel %vm471_vm2, %v1114_v49, 0.0 }
  0xfa   : > { %v611_v25 = vmul.f32 %v1043_v33, %v1043_v33 }
  0xfb   : > { %v542_v10 = vadd.f32 %v541_v4, %v540_v6  ;;  %v643_v56 = vadd.f32 %v642_v26, %v641_v34  ;;  %v654_v6 = vsel %vm471_vm2, %v604_v28, 0.0  ;;  %v666_v34 = vsel %vm471_vm2, %v610_v52, 0.0 }
  0xfd   : > { %v544_v14 = vadd.f32 %v543_v8, %v542_v10  ;;  %v645_v59 = vadd.f32 %v644_v54, %v643_v56  ;;  %v565_v10 = vsel %vm471_vm2, %v1063_v37, 0.0  ;;  %v613_v54 = vmul.f32 %v1080_v41, %v1080_v41 }
  0xfe   : > { %v615_v37 = vmul.f32 %v1114_v49, %v1114_v49  ;;  %v616_v41 = vmul.f32 %v1131_v53, %v1131_v53  ;;  %v511_v49 = vld [vmem:[%s1313_s3] sm:$0x1] }
  0xff   : > { %v546_v18 = vadd.f32 %v545_v12, %v544_v14  ;;  %v647_v62 = vadd.f32 %v646_v57, %v645_v59  ;;  %v658_v12 = vsel %vm471_vm2, %v606_v36, 0.0  ;;  %v672_v59 = vsel %vm471_vm2, %v613_v54, 0.0  ;;  %v584_v36 = vld [vmem:[%s1314_s4] sm:$0x1] }
 0x101   : > { %v548_v22 = vadd.f32 %v547_v16, %v546_v18  ;;  %v649_v1 = vadd.f32 %v648_v60, %v647_v62  ;;  %v569_v16 = vsel %vm471_vm2, %v1097_v45, 0.0 }
 0x103   : > { %v550_v38 = vadd.f32 %v549_v20, %v548_v22  ;;  %v651_v4 = vadd.f32 %v650_v63, %v649_v1  ;;  %v664_v22 = vsel %vm471_vm2, %v609_v48, 0.0  ;;  %v678_v63 = vsel %vm471_vm2, %v616_v41, 0.0 }
 0x105   : > { %v552_v42 = vadd.f32 %v551_v30, %v550_v38  ;;  %v653_v7 = vadd.f32 %v652_v23, %v651_v4 }
 0x107   : > { %v554_v46 = vadd.f32 %v553_v55, %v552_v42  ;;  %v655_v31 = vadd.f32 %v654_v6, %v653_v7  ;;  %v668_v55 = vsel %vm471_vm2, %v611_v25, 0.0  ;;  %v614_v42 = vmul.f32 %v1097_v45, %v1097_v45 }
 0x108   : > { %v676_v45 = vsel %vm471_vm2, %v615_v37, 0.0 }
 0x109   : > { %v556_v50 = vadd.f32 %v555_v58, %v554_v46  ;;  %v657_v14 = vadd.f32 %v656_v9, %v655_v31  ;;  %v674_v60 = vsel %vm471_vm2, %v614_v42, 0.0 }
 0x10b   : > { %v558_v2 = vadd.f32 %v557_v61, %v556_v50  ;;  %v659_v17 = vadd.f32 %v658_v12, %v657_v14 }
 0x10d   : > { %v560_v5 = vadd.f32 %v559_v0, %v558_v2  ;;  %v661_v20 = vadd.f32 %v660_v15, %v659_v17 }
 0x10f   : > { %v562_v8 = vadd.f32 %v561_v3, %v560_v5  ;;  %v663_v26 = vadd.f32 %v662_v39, %v661_v20 }
 0x111   : > { %v564_v11 = vadd.f32 %v563_v27, %v562_v8  ;;  %v665_v38 = vadd.f32 %v664_v22, %v663_v26 }
 0x113   : > { %v566_v35 = vadd.f32 %v565_v10, %v564_v11  ;;  %v667_v33 = vadd.f32 %v666_v34, %v665_v38 }
 0x115   : > { %v568_v18 = vadd.f32 %v567_v13, %v566_v35  ;;  %v669_v57 = vadd.f32 %v668_v55, %v667_v33 }
 0x117   : > { %v570_v21 = vadd.f32 %v569_v16, %v568_v18  ;;  %v671_v46 = vadd.f32 %v670_v51, %v669_v57 }
 0x119   : > { %v572_v30 = vadd.f32 %v571_v19, %v570_v21  ;;  %v673_v61 = vadd.f32 %v672_v59, %v671_v46 }
 0x11b   : > { %v574_v47 = vadd.f32 %v573_v43, %v572_v30  ;;  %v675_v50 = vadd.f32 %v674_v60, %v673_v61 }
 0x11d   : > { %v575_v56 = vrot.slane %v574_v47, 4  ;;  %v677_v0 = vadd.f32 %v676_v45, %v675_v50 }
 0x11f   : > { %v576_v58 = vadd.f32 %v575_v56, %v574_v47  ;;  %v679_v2 = vadd.f32 %v678_v63, %v677_v0 }
 0x121   : > { %v577_v24 = vrot.slane %v576_v58, 2  ;;  %v680_v53 = vrot.slane %v679_v2, 4 }
 0x123   : > { %v578_v62 = vadd.f32 %v577_v24, %v576_v58  ;;  %v681_v23 = vadd.f32 %v680_v53, %v679_v2 }
 0x125   : > { %v579_v28 = vrot.slane %v578_v62, 1  ;;  %v682_v3 = vrot.slane %v681_v23, 2 }
 0x127   : > { %v580_v1 = vadd.f32 %v579_v28, %v578_v62  ;;  %v683_v4 = vadd.f32 %v682_v3, %v681_v23 }
 0x129   : > { %v581_v32 = vadd.f32 %v580_v1, %v511_v49  ;;  %v684_v5 = vrot.slane %v683_v4, 1 }
 0x12b   : > { %583 = vst.msk [vmem:[%s1313_s3] sm:$0x1] %vm582_vm4, %v581_v32  ;;  %v685_v6 = vadd.f32 %v684_v5, %v683_v4 }
 0x12d   : > { %v686_v27 = vadd.f32 %v685_v6, %v584_v36 }
 0x12f   : > { %687 = vst.msk [vmem:[%s1314_s4] sm:$0x1] %vm582_vm4, %v686_v27 }
 0x130 PF: > { %s15_s15 = sadd.s32 1, %s898_s15  }
 0x131   : > { %p12_p5 = scmp.ge.s32.totalorder %s15_s15, 4  }
 0x133   :  { %14 = sbr.rel (!%p12_p5) target bundleno = 1 (0x1), region = 78 }

</bundles_post_ra>
